<compile_context>
chip_gen: v5e
topology: v5e:2x2
jax: 0.10.0
libtpu: 0.0.40
codegen_flags: <defaults>
</compile_context>

<pallas_src>
import functools

import jax
import jax.numpy as jnp
from jax.experimental import pallas as pl
from jax.experimental.pallas import tpu as pltpu

SMOOTH = 1e-05
IGNORE_INDEX = 255

_LANES = 128
_MAX_ROWS_PER_TILE = 512                 # 512 * 128 = 64K lanes per grid step
_VMEM_WORKSET_BYTES = 16 * 1024 * 1024   # tile-sizing budget (inputs + temps)
_VMEM_LIMIT_BYTES = 48 * 1024 * 1024     # scoped VMEM limit (< v7x's 64 MiB)


def _sublane_granularity(itemsize):
    """Rows-of-128 granularity so packed (sub-32-bit) dtypes tile natively."""
    return 8 * max(1, 4 // max(1, int(itemsize)))


def _pick_r_tile(C, in_bytes, t_bytes, R):
    """Spatial tile (rows of 128 lanes) derived from a VMEM working-set budget."""
    # Double-buffered logits + label blocks, ~3 f32 temporaries of the logits
    # block (e, p, p*t) and a handful of per-pixel f32 planes.
    per_lane = 2 * C * in_bytes + 2 * t_bytes + 3 * C * 4 + 8 * 4
    r = int(_VMEM_WORKSET_BYTES // (per_lane * _LANES))
    r = min(r, _MAX_ROWS_PER_TILE)
    if r >= R:
        return R
    g = _sublane_granularity(in_bytes)
    return max(g, (r // g) * g)


def _dice_partials_kernel(x_ref, t_ref, inter_ref, psum_ref, tsum_ref, *,
                          r_tile, s_valid, tiles_per_split, needs_mask,
                          ignore_index):
    # x_ref: (1, C, r_tile, 128) logits; t_ref: (1, 1, r_tile, 128) int labels.
    k = pl.program_id(2)

    @pl.when(k == 0)
    def _init():
        inter_ref[...] = jnp.zeros_like(inter_ref)
        psum_ref[...] = jnp.zeros_like(psum_ref)
        tsum_ref[...] = jnp.zeros_like(tsum_ref)

    x = x_ref[0].astype(jnp.float32)                     # (C, r_tile, 128)
    t = t_ref[0, 0].astype(jnp.int32)                    # widen narrow labels
    # targets[targets == ignore_index] = 0
    t_f = jnp.where(t == ignore_index, 0, t).astype(jnp.float32)

    if needs_mask:
        # Spatial positions beyond S: the pad-to-128 tail, the ragged last
        # row-block, and fully out-of-range steps of the last spatial split.
        kb = pl.program_id(1) * tiles_per_split + k      # unclamped block idx
        row = jax.lax.broadcasted_iota(jnp.int32, (r_tile, _LANES), 0)
        col = jax.lax.broadcasted_iota(jnp.int32, (r_tile, _LANES), 1)
        valid = (kb * r_tile + row) * _LANES + col < s_valid
        x = jnp.where(valid[None], x, 0.0)   # neutralize OOB garbage pre-exp
        t_f = jnp.where(valid, t_f, 0.0)

    # Per-pixel softmax over channels (axis 0 = cross-vreg VPU max/adds).
    x_max = jnp.max(x, axis=0)                           # (r_tile, 128)
    e = jnp.exp(x - x_max[None, :, :])                   # (C, r_tile, 128)
    z = jnp.sum(e, axis=0)                               # (r_tile, 128)
    inv_z = 1.0 / z                                      # exact, 1 per pixel
    if needs_mask:
        inv_z = jnp.where(valid, inv_z, 0.0)             # zero p for OOB px
    p = e * inv_z[None, :, :]                            # softmax probs

    # Lane-dense partial sums; the 128-lane reduce happens in the epilogue.
    inter_ref[...] += jnp.sum(p * t_f[None, :, :], axis=1)[None, None]
    psum_ref[...] += jnp.sum(p, axis=1)[None, None]
    tsum_ref[...] += jnp.sum(t_f, axis=0)[None, None, None]


def dice_loss(inputs, targets, *, smooth=SMOOTH, ignore_index=IGNORE_INDEX,
              s_tile=None, spatial_splits=None):
    """inputs: (N, C, H, W) float logits; targets: (N, H, W) int labels."""
    N, C, H, W = inputs.shape
    S = H * W
    R = pl.cdiv(S, _LANES)            # spatial rows of 128 lanes
    S128 = R * _LANES

    if inputs.dtype.itemsize > 4:
        inputs = inputs.astype(jnp.float32)
    if (not jnp.issubdtype(targets.dtype, jnp.integer)
            or targets.dtype.itemsize > 4):
        targets = targets.astype(jnp.int32)
    in_bytes = inputs.dtype.itemsize
    t_bytes = targets.dtype.itemsize

    if s_tile is None:
        r_tile = _pick_r_tile(C, in_bytes, t_bytes, R)
    else:
        r_tile = max(1, int(s_tile) // _LANES)
        g = _sublane_granularity(in_bytes)
        r_tile = R if r_tile >= R else min(R, max(g, (r_tile // g) * g))
    num_tiles = pl.cdiv(R, r_tile)

    # Narrow label dtypes need (16|32)-row native tiles; upcast if the chosen
    # tile does not satisfy the packed-sublane granularity.
    if t_bytes < 4 and r_tile % _sublane_granularity(t_bytes) != 0:
        targets = targets.astype(jnp.int32)
        t_bytes = 4

    # Optional parallel split of the spatial range so both v7x TensorCores get
    # work when the batch axis alone cannot balance them (N == 1 or odd N).
    if spatial_splits is None:
        spatial_splits = 2 if (N % 2 == 1 and num_tiles >= 2) else 1
    P = max(1, min(int(spatial_splits), num_tiles))
    tps = pl.cdiv(num_tiles, P)       # spatial tiles handled per split

    needs_mask = (P * tps * r_tile * _LANES) != S

    # Free contiguous view; a copy only happens for the (rare) pad-to-128 tail.
    # TODO(synk): handle S % 128 != 0 without the jnp.pad copy (element-offset
    # tail block) if ragged spatial sizes ever dominate.
    x = inputs.reshape(N, C, S)
    t = targets.reshape(N, 1, S)
    if S128 != S:
        x = jnp.pad(x, ((0, 0), (0, 0), (0, S128 - S)))
        t = jnp.pad(t, ((0, 0), (0, 0), (0, S128 - S)))
    x = x.reshape(N, C, R, _LANES)
    t = t.reshape(N, 1, R, _LANES)

    kernel = functools.partial(
        _dice_partials_kernel, r_tile=r_tile, s_valid=S, tiles_per_split=tps,
        needs_mask=needs_mask, ignore_index=ignore_index)

    if P * tps == num_tiles:
        def in_map(n, p, k):
            return (n, 0, p * tps + k, 0)
    else:
        last = num_tiles - 1

        def in_map(n, p, k):
            # Clamp the DMA for the tail steps of the last split; those steps
            # are fully masked in-kernel so the loaded data is irrelevant.
            return (n, 0, jnp.minimum(p * tps + k, last), 0)

    def out_map(n, p, k):
        return (n, p, 0, 0)

    out_shape = (
        jax.ShapeDtypeStruct((N, P, C, _LANES), jnp.float32),   # intersection
        jax.ShapeDtypeStruct((N, P, C, _LANES), jnp.float32),   # prob sums
        jax.ShapeDtypeStruct((N, P, 1, _LANES), jnp.float32),   # target sums
    )

    pix = N * P * tps * r_tile * _LANES        # pixels touched (incl. ragged)
    cost = pl.CostEstimate(
        flops=(6 * C + 8) * pix,
        transcendentals=(C + 1) * pix,
        bytes_accessed=int(N * C * S128 * in_bytes + N * S128 * t_bytes
                           + (2 * C + 1) * N * P * _LANES * 4),
    )

    inter, psum, tsum = pl.pallas_call(
        kernel,
        out_shape=out_shape,
        grid_spec=pltpu.PrefetchScalarGridSpec(
            num_scalar_prefetch=0,
            grid=(N, P, tps),
            in_specs=[
                pl.BlockSpec((1, C, r_tile, _LANES), in_map),
                pl.BlockSpec((1, 1, r_tile, _LANES), in_map),
            ],
            out_specs=[
                pl.BlockSpec((1, 1, C, _LANES), out_map),
                pl.BlockSpec((1, 1, C, _LANES), out_map),
                pl.BlockSpec((1, 1, 1, _LANES), out_map),
            ],
        ),
        compiler_params=pltpu.CompilerParams(
            dimension_semantics=("parallel", "parallel", "arbitrary"),
            vmem_limit_bytes=_VMEM_LIMIT_BYTES),
        cost_estimate=cost,
    )(x, t)

    # Tiny epilogue in plain JAX: fold the spatial splits and the 128 lanes.
    inter = inter.sum(axis=(1, 3))                            # (N, C)
    union = psum.sum(axis=(1, 3)) + tsum.sum(axis=(1, 3))     # (N, C) + (N, 1)
    dice = (2.0 * inter + smooth) / (union + smooth)
    # mean(dim=1).mean() == mean over all (N, C) entries (uniform class count)
    return 1.0 - jnp.mean(dice)


if __name__ == "__main__":
    key = jax.random.PRNGKey(0)
    ka, kb, kc, kd, ke, kf, kg = jax.random.split(key, 7)

    def reference(logits, labels, smooth=SMOOTH, ignore=IGNORE_INDEX):
        n, c = logits.shape[0], logits.shape[1]
        p = jax.nn.softmax(logits.astype(jnp.float32), axis=1).reshape(n, c, -1)
        tt = jnp.where(labels == ignore, 0, labels).astype(jnp.float32)
        tt = tt.reshape(n, -1)
        inter = jnp.sum(p * tt[:, None, :], axis=2)
        union = jnp.sum(p, axis=2) + jnp.sum(tt, axis=1)[:, None]
        dice = (2.0 * inter + smooth) / (union + smooth)
        return 1.0 - jnp.mean(dice)

    # Case A: even batch, f32 logits, ignore pixels; forced small tile so the
    # reduction axis runs 3 steps with a ragged last row-block (R=18, tile=8).
    N, C, H, W = 2, 4, 48, 48
    logits = jax.random.normal(ka, (N, C, H, W), dtype=jnp.float32)
    labels = jax.random.randint(kb, (N, H, W), 0, C, dtype=jnp.int32)
    labels = jnp.where(jax.random.bernoulli(kc, 0.1, (N, H, W)),
                       IGNORE_INDEX, labels)
    loss_a = dice_loss(logits, labels, s_tile=1024)
    jax.block_until_ready(loss_a)
    ref_a = reference(logits, labels)
    assert jnp.allclose(loss_a, ref_a, atol=1e-4, rtol=1e-4), (loss_a, ref_a)

    # Case B: odd batch (2-way spatial split across TensorCores), bf16 logits,
    # H*W not a multiple of 128 (pad + mask path), clamped tail split step.
    N2, C2, H2, W2 = 1, 5, 72, 72
    logits2 = jax.random.normal(kd, (N2, C2, H2, W2), dtype=jnp.bfloat16)
    labels2 = jax.random.randint(ke, (N2, H2, W2), 0, C2, dtype=jnp.int32)
    loss_b = dice_loss(logits2, labels2, s_tile=2048)
    jax.block_until_ready(loss_b)
    ref_b = reference(logits2, labels2)
    assert jnp.allclose(loss_b, ref_b, atol=1e-4, rtol=1e-4), (loss_b, ref_b)

    # Case C: int16 labels ride the narrow-dtype path (tile satisfies the
    # 16-sublane granularity); single-step reduction, no masking needed.
    N3, C3, H3, W3 = 2, 3, 64, 64
    logits3 = jax.random.normal(kf, (N3, C3, H3, W3), dtype=jnp.float32)
    labels3 = jax.random.randint(kg, (N3, H3, W3), 0, C3,
                                 dtype=jnp.int32).astype(jnp.int16)
    loss_c = dice_loss(logits3, labels3)
    jax.block_until_ready(loss_c)
    ref_c = reference(logits3, labels3)
    assert jnp.allclose(loss_c, ref_c, atol=1e-4, rtol=1e-4), (loss_c, ref_c)

    print("KERNEL_OK")
</pallas_src>

<mosaic_0001>
module attributes {stable_mosaic.version = 11 : i64} {
  func.func @_dice_partials_kernel(%arg0: i32, %arg1: i32, %arg2: i32, %arg3: memref<1x4x8x128xf32, #tpu.memory_space<vmem>>, %arg4: memref<1x1x8x128xi32, #tpu.memory_space<vmem>>, %arg5: memref<1x1x4x128xf32, #tpu.memory_space<vmem>>, %arg6: memref<1x1x4x128xf32, #tpu.memory_space<vmem>>, %arg7: memref<1x1x1x128xf32, #tpu.memory_space<vmem>>) attributes {dimension_semantics = [#tpu.dimension_semantics<parallel>, #tpu.dimension_semantics<parallel>, #tpu.dimension_semantics<arbitrary>], iteration_bounds = array<i64: 2, 1, 3>, scalar_prefetch = 0 : i64, scratch_operands = 0 : i64, tpu.core_type = #tpu.core_type<tc>, window_params = [{transform_indices = @transform_0, window_bounds = array<i64: 1, 4, 8, 128>}, {transform_indices = @transform_1, window_bounds = array<i64: 1, 1, 8, 128>}, {transform_indices = @transform_2, window_bounds = array<i64: 1, 1, 4, 128>}, {transform_indices = @transform_3, window_bounds = array<i64: 1, 1, 4, 128>}, {transform_indices = @transform_4, window_bounds = array<i64: 1, 1, 1, 128>}]} {
    %c0_i32 = arith.constant 0 : i32
    %0 = arith.cmpi eq, %arg2, %c0_i32 : i32
    %1 = arith.extui %0 : i1 to i32
    %c0_i32_0 = arith.constant 0 : i32
    %2 = arith.cmpi ne, %1, %c0_i32_0 : i32
    scf.if %2 {
      %cst_41 = arith.constant 0.000000e+00 : f32
      %62 = vector.broadcast %cst_41 : f32 to vector<1x1x4x128xf32>
      %c0_42 = arith.constant 0 : index
      %c0_43 = arith.constant 0 : index
      %c0_44 = arith.constant 0 : index
      %c0_45 = arith.constant 0 : index
      %63 = vector.load %arg5[%c0_42, %c0_43, %c0_44, %c0_45] : memref<1x1x4x128xf32, #tpu.memory_space<vmem>>, vector<1x1x4x128xf32>
      tpu.vector_store %arg5[%c0_42, %c0_43, %c0_44, %c0_45], %62 {strides = array<i32>} : memref<1x1x4x128xf32, #tpu.memory_space<vmem>>, vector<1x1x4x128xf32>,
      %cst_46 = arith.constant 0.000000e+00 : f32
      %64 = vector.broadcast %cst_46 : f32 to vector<1x1x4x128xf32>
      %c0_47 = arith.constant 0 : index
      %c0_48 = arith.constant 0 : index
      %c0_49 = arith.constant 0 : index
      %c0_50 = arith.constant 0 : index
      %65 = vector.load %arg6[%c0_47, %c0_48, %c0_49, %c0_50] : memref<1x1x4x128xf32, #tpu.memory_space<vmem>>, vector<1x1x4x128xf32>
      tpu.vector_store %arg6[%c0_47, %c0_48, %c0_49, %c0_50], %64 {strides = array<i32>} : memref<1x1x4x128xf32, #tpu.memory_space<vmem>>, vector<1x1x4x128xf32>,
      %cst_51 = arith.constant 0.000000e+00 : f32
      %66 = vector.broadcast %cst_51 : f32 to vector<1x1x1x128xf32>
      %c0_52 = arith.constant 0 : index
      %c0_53 = arith.constant 0 : index
      %c0_54 = arith.constant 0 : index
      %c0_55 = arith.constant 0 : index
      %67 = vector.load %arg7[%c0_52, %c0_53, %c0_54, %c0_55] : memref<1x1x1x128xf32, #tpu.memory_space<vmem>>, vector<1x1x1x128xf32>
      tpu.vector_store %arg7[%c0_52, %c0_53, %c0_54, %c0_55], %66 {strides = array<i32>} : memref<1x1x1x128xf32, #tpu.memory_space<vmem>>, vector<1x1x1x128xf32>,
    } else {
    }
    %c0 = arith.constant 0 : index
    %c0_1 = arith.constant 0 : index
    %c0_2 = arith.constant 0 : index
    %c0_3 = arith.constant 0 : index
    %3 = vector.load %arg3[%c0, %c0_1, %c0_2, %c0_3] : memref<1x4x8x128xf32, #tpu.memory_space<vmem>>, vector<1x4x8x128xf32>
    %4 = vector.shape_cast %3 : vector<1x4x8x128xf32> to vector<4x8x128xf32>
    %c0_4 = arith.constant 0 : index
    %c0_5 = arith.constant 0 : index
    %c0_6 = arith.constant 0 : index
    %c0_7 = arith.constant 0 : index
    %5 = vector.load %arg4[%c0_4, %c0_5, %c0_6, %c0_7] : memref<1x1x8x128xi32, #tpu.memory_space<vmem>>, vector<1x1x8x128xi32>
    %6 = vector.shape_cast %5 : vector<1x1x8x128xi32> to vector<8x128xi32>
    %c255_i32 = arith.constant 255 : i32
    %7 = vector.broadcast %c255_i32 : i32 to vector<8x128xi32>
    %8 = arith.cmpi eq, %6, %7 : vector<8x128xi32>
    %c0_i32_8 = arith.constant 0 : i32
    %9 = vector.broadcast %c0_i32_8 : i32 to vector<8x128xi32>
    %10 = arith.select %8, %9, %6 : vector<8x128xi1>, vector<8x128xi32>
    %11 = arith.sitofp %10 : vector<8x128xi32> to vector<8x128xf32>
    %c3_i32 = arith.constant 3 : i32
    %12 = arith.muli %arg1, %c3_i32 : i32
    %13 = arith.addi %12, %arg2 : i32
    %14 = tpu.iota {dimensions = array<i32: 0>} : vector<8x128xi32>
    %15 = tpu.iota {dimensions = array<i32: 1>} : vector<8x128xi32>
    %c8_i32 = arith.constant 8 : i32
    %16 = arith.muli %13, %c8_i32 : i32
    %17 = vector.broadcast %16 : i32 to vector<8x128xi32>
    %18 = arith.addi %17, %14 : vector<8x128xi32>
    %c128_i32 = arith.constant 128 : i32
    %19 = vector.broadcast %c128_i32 : i32 to vector<8x128xi32>
    %20 = arith.muli %18, %19 : vector<8x128xi32>
    %21 = arith.addi %20, %15 : vector<8x128xi32>
    %c2304_i32 = arith.constant 2304 : i32
    %22 = vector.broadcast %c2304_i32 : i32 to vector<8x128xi32>
    %23 = arith.cmpi slt, %21, %22 : vector<8x128xi32>
    %24 = vector.shape_cast %23 : vector<8x128xi1> to vector<1x8x128xi1>
    %cst = arith.constant 0.000000e+00 : f32
    %25 = vector.shape_cast %24 : vector<1x8x128xi1> to vector<1x8x128xi1>
    %26 = vector.broadcast %25 : vector<1x8x128xi1> to vector<4x8x128xi1>
    %27 = vector.broadcast %cst : f32 to vector<4x8x128xf32>
    %28 = arith.select %26, %4, %27 : vector<4x8x128xi1>, vector<4x8x128xf32>
    %cst_9 = arith.constant 0.000000e+00 : f32
    %29 = vector.broadcast %cst_9 : f32 to vector<8x128xf32>
    %30 = arith.select %23, %11, %29 : vector<8x128xi1>, vector<8x128xf32>
    %cst_10 = arith.constant dense<0xFF800000> : vector<8x128xf32>
    %31 = vector.multi_reduction <maximumf>, %28, %cst_10 [0] : vector<4x8x128xf32> to vector<8x128xf32>
    %32 = vector.shape_cast %31 : vector<8x128xf32> to vector<1x8x128xf32>
    %33 = vector.broadcast %32 : vector<1x8x128xf32> to vector<4x8x128xf32>
    %34 = arith.subf %28, %33 : vector<4x8x128xf32>
    %35 = math.exp %34 : vector<4x8x128xf32>
    %cst_11 = arith.constant dense<0.000000e+00> : vector<8x128xf32>
    %36 = vector.multi_reduction <add>, %35, %cst_11 [0] : vector<4x8x128xf32> to vector<8x128xf32>
    %cst_12 = arith.constant 1.000000e+00 : f32
    %37 = vector.broadcast %cst_12 : f32 to vector<8x128xf32>
    %38 = arith.divf %37, %36 : vector<8x128xf32>
    %cst_13 = arith.constant 0.000000e+00 : f32
    %39 = vector.broadcast %cst_13 : f32 to vector<8x128xf32>
    %40 = arith.select %23, %38, %39 : vector<8x128xi1>, vector<8x128xf32>
    %41 = vector.shape_cast %40 : vector<8x128xf32> to vector<1x8x128xf32>
    %42 = vector.broadcast %41 : vector<1x8x128xf32> to vector<4x8x128xf32>
    %43 = arith.mulf %35, %42 : vector<4x8x128xf32>
    %c0_14 = arith.constant 0 : index
    %c0_15 = arith.constant 0 : index
    %c0_16 = arith.constant 0 : index
    %c0_17 = arith.constant 0 : index
    %44 = vector.load %arg5[%c0_14, %c0_15, %c0_16, %c0_17] : memref<1x1x4x128xf32, #tpu.memory_space<vmem>>, vector<1x1x4x128xf32>
    %45 = vector.shape_cast %30 : vector<8x128xf32> to vector<1x8x128xf32>
    %46 = vector.broadcast %45 : vector<1x8x128xf32> to vector<4x8x128xf32>
    %47 = arith.mulf %43, %46 : vector<4x8x128xf32>
    %cst_18 = arith.constant dense<0.000000e+00> : vector<4x128xf32>
    %48 = vector.multi_reduction <add>, %47, %cst_18 [1] : vector<4x8x128xf32> to vector<4x128xf32>
    %49 = vector.shape_cast %48 : vector<4x128xf32> to vector<1x1x4x128xf32>
    %50 = arith.addf %44, %49 : vector<1x1x4x128xf32>
    %c0_19 = arith.constant 0 : index
    %c0_20 = arith.constant 0 : index
    %c0_21 = arith.constant 0 : index
    %c0_22 = arith.constant 0 : index
    %51 = vector.load %arg5[%c0_19, %c0_20, %c0_21, %c0_22] : memref<1x1x4x128xf32, #tpu.memory_space<vmem>>, vector<1x1x4x128xf32>
    tpu.vector_store %arg5[%c0_19, %c0_20, %c0_21, %c0_22], %50 {strides = array<i32>} : memref<1x1x4x128xf32, #tpu.memory_space<vmem>>, vector<1x1x4x128xf32>,
    %c0_23 = arith.constant 0 : index
    %c0_24 = arith.constant 0 : index
    %c0_25 = arith.constant 0 : index
    %c0_26 = arith.constant 0 : index
    %52 = vector.load %arg6[%c0_23, %c0_24, %c0_25, %c0_26] : memref<1x1x4x128xf32, #tpu.memory_space<vmem>>, vector<1x1x4x128xf32>
    %cst_27 = arith.constant dense<0.000000e+00> : vector<4x128xf32>
    %53 = vector.multi_reduction <add>, %43, %cst_27 [1] : vector<4x8x128xf32> to vector<4x128xf32>
    %54 = vector.shape_cast %53 : vector<4x128xf32> to vector<1x1x4x128xf32>
    %55 = arith.addf %52, %54 : vector<1x1x4x128xf32>
    %c0_28 = arith.constant 0 : index
    %c0_29 = arith.constant 0 : index
    %c0_30 = arith.constant 0 : index
    %c0_31 = arith.constant 0 : index
    %56 = vector.load %arg6[%c0_28, %c0_29, %c0_30, %c0_31] : memref<1x1x4x128xf32, #tpu.memory_space<vmem>>, vector<1x1x4x128xf32>
    tpu.vector_store %arg6[%c0_28, %c0_29, %c0_30, %c0_31], %55 {strides = array<i32>} : memref<1x1x4x128xf32, #tpu.memory_space<vmem>>, vector<1x1x4x128xf32>,
    %c0_32 = arith.constant 0 : index
    %c0_33 = arith.constant 0 : index
    %c0_34 = arith.constant 0 : index
    %c0_35 = arith.constant 0 : index
    %57 = vector.load %arg7[%c0_32, %c0_33, %c0_34, %c0_35] : memref<1x1x1x128xf32, #tpu.memory_space<vmem>>, vector<1x1x1x128xf32>
    %cst_36 = arith.constant dense<0.000000e+00> : vector<128xf32>
    %58 = vector.multi_reduction <add>, %30, %cst_36 [0] : vector<8x128xf32> to vector<128xf32>
    %59 = vector.shape_cast %58 : vector<128xf32> to vector<1x1x1x128xf32>
    %60 = arith.addf %57, %59 : vector<1x1x1x128xf32>
    %c0_37 = arith.constant 0 : index
    %c0_38 = arith.constant 0 : index
    %c0_39 = arith.constant 0 : index
    %c0_40 = arith.constant 0 : index
    %61 = vector.load %arg7[%c0_37, %c0_38, %c0_39, %c0_40] : memref<1x1x1x128xf32, #tpu.memory_space<vmem>>, vector<1x1x1x128xf32>
    tpu.vector_store %arg7[%c0_37, %c0_38, %c0_39, %c0_40], %60 {strides = array<i32>} : memref<1x1x1x128xf32, #tpu.memory_space<vmem>>, vector<1x1x1x128xf32>,
    return
  }
  func.func @transform_0(%arg0: i32, %arg1: i32, %arg2: i32) -> (i32, i32, i32, i32) {
    %c3_i32 = arith.constant 3 : i32
    %0 = arith.muli %arg1, %c3_i32 : i32
    %1 = arith.addi %0, %arg2 : i32
    %c0_i32 = arith.constant 0 : i32
    %c0_i32_0 = arith.constant 0 : i32
    %c0_i32_1 = arith.constant 0 : i32
    return %arg0, %c0_i32, %1, %c0_i32_0 : i32, i32, i32, i32
  }
  func.func @transform_1(%arg0: i32, %arg1: i32, %arg2: i32) -> (i32, i32, i32, i32) {
    %c3_i32 = arith.constant 3 : i32
    %0 = arith.muli %arg1, %c3_i32 : i32
    %1 = arith.addi %0, %arg2 : i32
    %c0_i32 = arith.constant 0 : i32
    %c0_i32_0 = arith.constant 0 : i32
    %c0_i32_1 = arith.constant 0 : i32
    return %arg0, %c0_i32, %1, %c0_i32_0 : i32, i32, i32, i32
  }
  func.func @transform_2(%arg0: i32, %arg1: i32, %arg2: i32) -> (i32, i32, i32, i32) {
    %c0_i32 = arith.constant 0 : i32
    %c0_i32_0 = arith.constant 0 : i32
    %c0_i32_1 = arith.constant 0 : i32
    return %arg0, %arg1, %c0_i32, %c0_i32_0 : i32, i32, i32, i32
  }
  func.func @transform_3(%arg0: i32, %arg1: i32, %arg2: i32) -> (i32, i32, i32, i32) {
    %c0_i32 = arith.constant 0 : i32
    %c0_i32_0 = arith.constant 0 : i32
    %c0_i32_1 = arith.constant 0 : i32
    return %arg0, %arg1, %c0_i32, %c0_i32_0 : i32, i32, i32, i32
  }
  func.func @transform_4(%arg0: i32, %arg1: i32, %arg2: i32) -> (i32, i32, i32, i32) {
    %c0_i32 = arith.constant 0 : i32
    %c0_i32_0 = arith.constant 0 : i32
    %c0_i32_1 = arith.constant 0 : i32
    return %arg0, %arg1, %c0_i32, %c0_i32_0 : i32, i32, i32, i32
  }
}

</mosaic_0001>

<bundles_post_ra>
// kernel: tpu_custom_call.1
= control target key start
LH: loop header
LB: loop body
LE: loop exit
PB: predicated region body
PF: predicated region fallthrough
CT: control target
= control target key end

     0   :  { %s1305_s0 = inlined_call_operand.vmem [shape: f32[2,4,18,128], index: 0, kind: input, shape index: {}]   ;;  %s1306_s1 = inlined_call_operand.vmem [shape: s32[2,1,18,128], index: 1, kind: input, shape index: {}]   ;;  %s1307_s2 = inlined_call_operand.hbm [shape: f32[2,1,4,128], index: 2, kind: output, shape index: {0}]   ;;  %s1308_s3 = inlined_call_operand.hbm [shape: f32[2,1,4,128], index: 3, kind: output, shape index: {1}]   ;;  %s1309_s4 = inlined_call_operand.hbm [shape: f32[2,1,1,128], index: 4, kind: output, shape index: {2}]  }
   0x1   :  { %1316 = sst [smem:[#allocation14_spill]] %s1305_s0 }
   0x2   :  { %10 = vsyncpa [#allocation4], 0 }
   0x3   :  { %12 = vsyncpa [#allocation4 + $0x1], 0 }
   0x4   :  { %13 = vsyncpa [#allocation6], 0 }
   0x5   :  { %15 = vsyncpa [#allocation6 + $0x1], 0  ;;  %s1046_s15 = smov 0   ;;  %s1048_s16 = smov 0  }
   0x6   :  { %s1050_s17 = smov 0   ;;  %s1052_s18 = smov 0  }
   0x7   :  { %s1054_s19 = smov 0   ;;  %s1056_s20 = smov 0  }
   0x8   :  { %s1058_s21 = smov 0   ;;  %s1060_s22 = smov 0  }
   0x9   :  { %s1062_s23 = smov 0   ;;  %s1064_s24 = smov 0  }
   0xa LB: > { %1317 = sst [smem:[#allocation10_spill]] %s1010_s22  ;;  %s1311_s25 = sadd.s32 4294967295, %s1018_s24   ;;  %s1018_s24 = sphi %s1064_s24, %s21_s24   ;;  %s1014_s23 = sphi %s1062_s23, %s1330_s23   ;;  %s1010_s22 = sphi %s1060_s22, %s1329_s22   ;;  %s1006_s21 = sphi %s1058_s21, %s1328_s21   ;;  %s1002_s20 = sphi %s1056_s20, %s1327_s20   ;;  %s998_s19 = sphi %s1054_s19, %s1335_s19   ;;  %s994_s18 = sphi %s1052_s18, %s1334_s18   ;;  %s990_s17 = sphi %s1050_s17, %s1333_s17   ;;  %s986_s16 = sphi %s1048_s16, %s1332_s16   ;;  %s982_s15 = sphi %s1046_s15, %s1331_s15  }
   0xb   : > { %1318 = sst [smem:[#allocation11_spill]] %s1014_s23  ;;  %s1310_s26 = sadd.s32 4294967294, %s1018_s24  }
   0xc   : > { %s33_s27 = sadd.s32 1, %s1010_s22  ;;  %s40_s28 = sadd.s32 1, %s1014_s23 }
   0xd   : > { %p34_p0 = scmp.ge.s32.totalorder %s33_s27, 3  ;;  %s53_s29 = sadd.s32 1, %s998_s19 }
   0xe   : > { %p60_p1 = scmp.ne.s32.totalorder %s998_s19, %s994_s18  ;;  %p61_p2 = scmp.eq.s32.totalorder %s1018_s24, 0 }
   0xf   : > { %s1337_s27 = smov (%p34_p0, %s33_s27), 0  ;;  %s1339_s28 = smov (!%p34_p0, %s40_s28), %s1014_s23 }
  0x10   : > { %1319 = sst [smem:[#allocation12_spill]] %s1337_s27  ;;  %s49_s30 = ssub.s32 %s1010_s22, %s1337_s27 }
  0x11   : > { %p1109_p3 = por %p61_p2, %p60_p1  ;;  %p42_p4 = scmp.ge.s32.totalorder %s1339_s28, 2 }
  0x12   : > { %s113_s6 = sadd.s32 1, %s990_s17  ;;  %p123_p5 = scmp.ne.s32.totalorder %s990_s17, %s986_s16 }
  0x13   : > { %p124_p6 = scmp.eq.s32.totalorder %s1311_s25, 5  ;;  %s1341_s28 = smov (%p42_p4, %s1339_s28), 0 }
  0x14   : > { %1321 = sst [smem:[#allocation13_spill]] %s1341_s28  ;;  %p129_p8 = scmp.ne.s32.totalorder %s986_s16, %s982_s15 }
  0x15   : > { %p1120_p7 = por %p124_p6, %p123_p5  ;;  %s48_s8 = ssub.s32 %s1014_s23, %s1341_s28 }
  0x16   : > { %p130_p9 = scmp.eq.s32.totalorder %s1310_s26, 5  ;;  %s50_s9 = sor.u32 %s49_s30, %s48_s8 }
  0x17   : > { %p111_p10 = scmp.eq.s32.totalorder %s48_s8, 0  ;;  %p51_p11 = scmp.eq.s32.totalorder %s50_s9, 0 }
  0x18   : > { %p1130_p12 = por %p130_p9, %p129_p8  ;;  %p720_p13 = scmp.ge.s32.totalorder %s1018_s24, 6 }
  0x19   : > { %s1135_s11 = scalar_select %p111_p10, %s990_s17, %s113_s6  }
  0x1a   : > { %s1138_s12 = scalar_select %p51_p11, %s998_s19, %s53_s29  }
  0x1b   : > { %202 = sbr.rel (%p720_p13) target bundleno = 46 (0x2e), region = 16 }
  0x20   : > { %205 = sbr.rel (!%p1109_p3) target bundleno = 46 (0x2e), region = 20  ;;  %s207_s13 = sand.u32 (%p1109_p3), 1, %s998_s19  }
  0x21   : > { %s738_s14 = smul.u32 (%p1109_p3), 12, %s1014_s23  ;;  %s721_s30 = sshll.u32 (%p1109_p3), %s207_s13, 5 }
  0x22   : > { %s1324_s0 = sld [smem:[#allocation14_spill]] (%p1109_p3)  ;;  %s209_s29 = scalar_lea.vmem (%p1109_p3), [#allocation2], %s721_s30 }
  0x23   : > { %s213_s8 = sadd.s32 (%p1109_p3), %s1010_s22, %s738_s14 }
  0x24   : > { %s722_s9 = sshll.u32 (%p1109_p3), %s213_s8, 3 }
  0x28   : > { %s215_s6 = scalar_lea.vmem %s1324_s0, %s722_s9 }
  0x29   : > { %v250_v0 = vld [vmem:[%s215_s6] sm:$0xff]  ;;  %v252_v1 = vld [vmem:[%s215_s6 + $0x18] sm:$0xff]  ;;  %v254_v2 = vld [vmem:[%s215_s6 + $0x30] sm:$0xff] }
  0x2a   : > { %251 = vst [vmem:[%s209_s29] sm:$0xff] %v250_v0  ;;  %v256_v3 = vld [vmem:[%s215_s6 + $0x48] sm:$0xff] }
  0x2b   : > { %253 = vst [vmem:[%s209_s29 + $0x8] sm:$0xff] %v252_v1 }
  0x2c   : > { %255 = vst [vmem:[%s209_s29 + $0x10] sm:$0xff] %v254_v2 }
  0x2d   : > { %257 = vst [vmem:[%s209_s29 + $0x18] sm:$0xff] %v256_v3 }
  0x2e PF: > { %p723_p0 = scmp.ge.s32.totalorder %s1018_s24, 1  ;;  %p277_p1 = scmp.lt.s32.totalorder %s1018_s24, 7 }
  0x30   : > { %p278_p2 = pnand %p723_p0, %p277_p1 }
  0x31   : > { %s284_s25 = sand.u32 (!%p278_p2), 1, %s994_s18   ;;  %s1153_s26 = sand.u32 (!%p278_p2), 1, %s986_s16  }
  0x32   : > { %281 = sbr.rel (%p278_p2) target bundleno = 166 (0xa6), region = 62  ;;  %s724_s5 = sshll.u32 (!%p278_p2), %s284_s25, 5 }
  0x33   : > { %s725_s13 = sshll.u32 (!%p278_p2), %s1153_s26, 2  ;;  %p332_p3 = scmp.lt.s32.totalorder (!%p278_p2), %s1006_s21, 1 }
  0x34   : > { %p334_p4 = scmp.lt.s32.totalorder (!%p278_p2), %s1002_s20, 2  ;;  %s286_s27 = scalar_lea.vmem (!%p278_p2), [#allocation2], %s724_s5 }
  0x35   : > { %s1165_s18 = scalar_lea.vmem (!%p278_p2), [#allocation3], %s725_s13  ;;  %s1167_s23 = scalar_lea.vmem (!%p278_p2), [#allocation5], %s725_s13 }
  0x36   : > { %s1170_s22 = scalar_lea.vmem (!%p278_p2), [#allocation7], %s1153_s26  ;;  %p728_p5 = scmp.ne.s32.totalorder (!%p278_p2), %s1002_s20, 0 }
  0x37   : > { %s333_s14 = scalar_select %p332_p3, %s1006_s21, 1 }
  0x38   : > { %s335_s30 = scalar_select %p334_p4, %s1002_s20, 2 }
  0x39   : > { %s739_s8 = smul.u32 3, %s333_s14 }
  0x3a   : > { %345 = sbr.rel (%p728_p5) target bundleno = 67 (0x43), region = 70 }
  0x3b   : > { %s337_s9 = sadd.s32 %s739_s8, %s335_s30 }
  0x3c   : > { %s727_s6 = sshll.u32 %s337_s9, 3 }
  0x3d   : > { %s1163_s28 = scalar_lea.vmem %s1306_s1, %s727_s6 }
  0x3f   : > { %v1020_v4 = vmov 0.0  }
  0x40   : > { %346 = vst [vmem:[%s1165_s18] sm:$0xf] %v1020_v4 }
  0x41   : > { %347 = vst [vmem:[%s1167_s23] sm:$0xf] %v1020_v4 }
  0x42   : > { %348 = vst [vmem:[%s1170_s22] sm:$0x1] %v1020_v4 }
  0x43 PF: > { %v359_v5 = vlaneseq  ;;  %s731_s0 = sshll.u32 %s1002_s20, 3  ;;  %v349_v11 = vld [vmem:[%s286_s27] sm:$0xff]  ;;  %v350_v12 = vld [vmem:[%s286_s27 + $0x8] sm:$0xff]  ;;  %v351_v13 = vld [vmem:[%s286_s27 + $0x10] sm:$0xff]  ;;  %vm447_vm6 = vcmask 1041409   ;;  %vm449_vm7 = vcmask 1042434   ;;  %s550_s9 = scalar_lea.hbm %s1309_s4, %s1006_s21 }
  0x44   : > { %v364_v6 = vstv %s731_s0  ;;  %v352_v14 = vld [vmem:[%s286_s27 + $0x18] sm:$0xff]  ;;  %v353_v27 = vld [vmem:[%s1163_s28] sm:$0xff]  ;;  %vm451_vm8 = vcmask 1043459   ;;  %s734_s20 = sshll.u32 %s1006_s21, 2  ;;  %s1325_s27 = sadd.s32 4294967295, %s1018_s24  }
  0x45   : > { %v360_v7 = vshrl.u32 %v359_v5, 7  ;;  %v362_v8 = vand.u32 127, %v359_v5  ;;  %v729_v32 = vcvt.s32.f32 %v353_v27  ;;  %vm354_vm1 = vcmp.eq.s32.totalorder %v353_v27, 255  ;;  %s1189_s28 = sand.u32 1, %s1325_s27   ;;  %s1194_s13 = scalar_lea.hbm %s1308_s3, %s734_s20 }
  0x46   : > { %s538_s14 = sshll.u32 %s1167_s23, 4  ;;  %s521_s0 = scalar_lea.hbm %s1307_s2, %s734_s20  ;;  %s1206_s14 = int_to_ptr.vmem [resolvable:$true] %s538_s14 }
  0x47   : > { %v365_v9 = vadd.s32 %v364_v6, %v360_v7  ;;  %v730_v33 = vsel %vm354_vm1, 0.0, %v729_v32  ;;  %s540_s27 = sshll.u32 %s1194_s13, 4  ;;  %s552_s21 = sshll.u32 %s1170_s22, 4  ;;  %s541_s27 = int_to_ptr.hbm [resolvable:$true] %s540_s27  ;;  %s1218_s21 = int_to_ptr.vmem [resolvable:$true] %s552_s21 }
  0x48   : > { %s1211_s25 = sshll.u32 %s550_s9, 4  ;;  %s523_s20 = sshll.u32 %s1165_s18, 4  ;;  %s555_s25 = int_to_ptr.hbm [resolvable:$true] %s1211_s25  ;;  %s1223_s20 = int_to_ptr.vmem [resolvable:$true] %s523_s20 }
  0x49   : > { %v366_v10 = vmul.u32 128, %v365_v9  ;;  %v491_v47 = vld [vmem:[%s1170_s22] sm:$0x1]  ;;  %s525_s5 = sshll.u32 %s521_s0, 4  ;;  %s862_s13 = sshra.s32 %s541_s27, 4  ;;  %s1225_s5 = int_to_ptr.hbm [resolvable:$true] %s525_s5  ;;  %s863_s13 = int_to_ptr.hbm [resolvable:$true] %s862_s13 }
  0x4a   : > { %s864_s30 = scalar_lea.hbm %s863_s13, 4  ;;  %s868_s6 = scalar_lea.hbm %s1308_s3, 8 }
  0x4b   : > { %v367_v15 = vadd.s32 %v366_v10, %v362_v8  ;;  %p865_p6 = scmp.ne.s32.totalorder %s863_s13, %s864_s30  ;;  %p869_p10 = scmp.lt.s32.totalorder %s863_s13, %s1308_s3 }
  0x4c   : > { %p870_p11 = scmp.lt.s32.totalorder %s868_s6, %s864_s30 }
  0x4d   : > { %vm368_vm0 = vcmp.lt.s32.totalorder %v367_v15, 2304  ;;  %p866_p8 = pnand %p865_p6, %p1120_p7 }
  0x4e   : > { %v371_v16 = vsel %vm368_vm0, %v349_v11, 0.0  ;;  %v372_v17 = vsel %vm368_vm0, %v350_v12, 0.0  ;;  %v373_v18 = vsel %vm368_vm0, %v351_v13, 0.0  ;;  %v374_v19 = vsel %vm368_vm0, %v352_v14, 0.0  ;;  %p871_p13 = por %p870_p11, %p869_p10 }
  0x4f   : > { %v376_v20 = vmax.f32 %v371_v16, %v372_v17  ;;  %v377_v21 = vmax.f32 %v373_v18, %v374_v19  ;;  %v375_v36 = vsel %vm368_vm0, %v730_v33, 0.0  ;;  %p867_p9 = pneg %p866_p8 }
  0x50   : > { %v492_v39 = vrot.slane %v375_v36, 4 }
  0x51   : > { %v378_v22 = vmax.f32 %v376_v20, %v377_v21  ;;  %p872_p0 = pnand %p871_p13, %p867_p9 }
  0x52   : > { %v493_v42 = vadd.f32 %v492_v39, %v375_v36 }
  0x53   : > { %v379_v23 = vsub.f32 %v371_v16, %v378_v22  ;;  %v380_v24 = vsub.f32 %v372_v17, %v378_v22  ;;  %v381_v25 = vsub.f32 %v373_v18, %v378_v22  ;;  %v382_v26 = vsub.f32 %v374_v19, %v378_v22 }
  0x54   : > { %v494_v44 = vrot.slane %v493_v42, 2 }
  0x55   : > { %v383_v28 = vmul.f32 1.442695, %v379_v23  ;;  %v385_v29 = vmul.f32 1.442695, %v380_v24  ;;  %v387_v30 = vmul.f32 1.442695, %v381_v25 }
  0x56   : > { %v389_v31 = vmul.f32 1.442695, %v382_v26  ;;  %v495_v45 = vadd.f32 %v494_v44, %v493_v42 }
  0x57   : > { %838 = vpow2.f32 %v383_v28 }
  0x58   : > { %840 = vpow2.f32 %v385_v29  ;;  %v496_v46 = vrot.slane %v495_v45, 1 }
  0x59   : > { %842 = vpow2.f32 %v387_v30 }
  0x5a   : > { %844 = vpow2.f32 %v389_v31  ;;  %v497_v48 = vadd.f32 %v496_v46, %v495_v45 }
  0x5c   : > { %v498_v51 = vadd.f32 %v497_v48, %v491_v47 }
  0x5d   : > { %v839_v34 = vpop.eup %838 }
  0x5e   : > { %v841_v35 = vpop.eup %840  ;;  %499 = vst [vmem:[%s1170_s22] sm:$0x1] %v498_v51  ;;  %s506_s22 = scalar_lea.sflag [#allocation6], %s1189_s28 }
  0x5f   : > { %v843_v37 = vpop.eup %842  ;;  %v391_v38 = vadd.f32 %v841_v35, %v839_v34 }
  0x60   : > { %v845_v40 = vpop.eup %844 }
  0x61   : > { %v392_v41 = vadd.f32 %v843_v37, %v391_v38 }
  0x63   : > { %v393_v43 = vadd.f32 %v845_v40, %v392_v41 }
  0x65   : > { %846 = vrcp.f32 %v393_v43  ;;  %v405_v52 = vand.u32 2147483648, %v393_v43  ;;  %vm399_vm2 = vweird.f32 %v393_v43  ;;  %v403_v54 = vand.u32 2147483647, %v393_v43 }
  0x67   : > { %v406_v56 = vor.u32 1.1754944e-38, %v405_v52  ;;  %vm404_vm5 = vcmp.eq.f32.partialorder %v403_v54, 8.507059e+37 }
  0x6b   : > { %v847_v49 = vpop.eup %846 }
  0x6c   : > { %v395_v50 = vmul.f32 %v847_v49, %v393_v43  ;;  %vm400_vm3 = vweird.f32 %v847_v49 }
  0x6d   : > { %vm401_vm4 = vmor %vm399_vm2, %vm400_vm3 }
  0x6e   : > { %v396_v53 = vsub.f32 1.0, %v395_v50 }
  0x70   : > { %v397_v55 = vmul.f32 %v847_v49, %v396_v53 }
  0x72   : > { %v398_v57 = vadd.f32 %v847_v49, %v397_v55 }
  0x74   : > { %v402_v58 = vsel %vm401_vm4, %v847_v49, %v398_v57  ;;  %v456_v49 = vld [vmem:[%s1167_s23] sm:$0xf] }
  0x75   : > { %v407_v59 = vsel %vm404_vm5, %v406_v56, %v402_v58  ;;  %v414_v58 = vld [vmem:[%s1165_s18] sm:$0xf] }
  0x76   : > { %v409_v60 = vsel %vm368_vm0, %v407_v59, 0.0 }
  0x77   : > { %v410_v61 = vmul.f32 %v839_v34, %v409_v60  ;;  %v411_v62 = vmul.f32 %v841_v35, %v409_v60  ;;  %v412_v63 = vmul.f32 %v843_v37, %v409_v60  ;;  %v413_v0 = vmul.f32 %v845_v40, %v409_v60 }
  0x79   : > { %v457_v1 = vrot.slane %v410_v61, 4  ;;  %v463_v2 = vrot.slane %v411_v62, 4  ;;  %v469_v3 = vrot.slane %v412_v63, 4  ;;  %v475_v4 = vrot.slane %v413_v0, 4 }
  0x7a   : > { %v415_v5 = vmul.f32 %v410_v61, %v375_v36  ;;  %v416_v6 = vmul.f32 %v411_v62, %v375_v36  ;;  %v417_v7 = vmul.f32 %v412_v63, %v375_v36  ;;  %v418_v8 = vmul.f32 %v413_v0, %v375_v36 }
  0x7b   : > { %v458_v9 = vadd.f32 %v457_v1, %v410_v61  ;;  %v464_v10 = vadd.f32 %v463_v2, %v411_v62  ;;  %v470_v11 = vadd.f32 %v469_v3, %v412_v63  ;;  %v476_v12 = vadd.f32 %v475_v4, %v413_v0 }
  0x7c   : > { %v419_v13 = vrot.slane %v415_v5, 4  ;;  %v425_v14 = vrot.slane %v416_v6, 4  ;;  %v431_v15 = vrot.slane %v417_v7, 4  ;;  %v437_v16 = vrot.slane %v418_v8, 4 }
  0x7d   : > { %v459_v17 = vrot.slane %v458_v9, 2  ;;  %v465_v18 = vrot.slane %v464_v10, 2  ;;  %v471_v19 = vrot.slane %v470_v11, 2  ;;  %v477_v20 = vrot.slane %v476_v12, 2 }
  0x7e   : > { %v420_v21 = vadd.f32 %v419_v13, %v415_v5  ;;  %v426_v22 = vadd.f32 %v425_v14, %v416_v6  ;;  %v432_v23 = vadd.f32 %v431_v15, %v417_v7  ;;  %v438_v24 = vadd.f32 %v437_v16, %v418_v8 }
  0x7f   : > { %v460_v25 = vadd.f32 %v459_v17, %v458_v9  ;;  %v466_v26 = vadd.f32 %v465_v18, %v464_v10  ;;  %v472_v27 = vadd.f32 %v471_v19, %v470_v11  ;;  %v478_v28 = vadd.f32 %v477_v20, %v476_v12 }
  0x80   : > { %v421_v29 = vrot.slane %v420_v21, 2  ;;  %v427_v30 = vrot.slane %v426_v22, 2  ;;  %v433_v31 = vrot.slane %v432_v23, 2  ;;  %v439_v32 = vrot.slane %v438_v24, 2 }
  0x81   : > { %v461_v33 = vrot.slane %v460_v25, 1  ;;  %v467_v34 = vrot.slane %v466_v26, 1  ;;  %v473_v35 = vrot.slane %v472_v27, 1  ;;  %v479_v36 = vrot.slane %v478_v28, 1 }
  0x82   : > { %v422_v37 = vadd.f32 %v421_v29, %v420_v21  ;;  %v428_v38 = vadd.f32 %v427_v30, %v426_v22  ;;  %v434_v39 = vadd.f32 %v433_v31, %v432_v23  ;;  %v440_v40 = vadd.f32 %v439_v32, %v438_v24 }
  0x83   : > { %v462_v41 = vadd.f32 %v461_v33, %v460_v25  ;;  %v468_v42 = vadd.f32 %v467_v34, %v466_v26  ;;  %v474_v43 = vadd.f32 %v473_v35, %v472_v27  ;;  %v480_v44 = vadd.f32 %v479_v36, %v478_v28 }
  0x84   : > { %v423_v45 = vrot.slane %v422_v37, 1  ;;  %v429_v46 = vrot.slane %v428_v38, 1  ;;  %v435_v47 = vrot.slane %v434_v39, 1  ;;  %v441_v48 = vrot.slane %v440_v40, 1 }
  0x85   : > { %v485_v50 = vsel %vm447_vm6, %v468_v42, %v462_v41 }
  0x86   : > { %v486_v51 = vsel %vm449_vm7, %v474_v43, %v485_v50  ;;  %v424_v52 = vadd.f32 %v423_v45, %v422_v37  ;;  %v430_v53 = vadd.f32 %v429_v46, %v428_v38  ;;  %v436_v54 = vadd.f32 %v435_v47, %v434_v39 }
  0x87   : > { %v487_v55 = vsel %vm451_vm8, %v480_v44, %v486_v51  ;;  %v442_v56 = vadd.f32 %v441_v48, %v440_v40 }
  0x88   : > { %v489_v57 = vadd.f32 %v487_v55, %v456_v49  ;;  %v448_v59 = vsel %vm447_vm6, %v430_v53, %v424_v52 }
  0x89   : > { %v450_v60 = vsel %vm449_vm7, %v436_v54, %v448_v59 }
  0x8a   : > { %490 = vst [vmem:[%s1167_s23] sm:$0xf] %v489_v57  ;;  %v452_v61 = vsel %vm451_vm8, %v442_v56, %v450_v60 }
  0x8b   : > { %v454_v62 = vadd.f32 %v452_v61, %v414_v58 }
  0x8c   : > { %875 = shalt.err (!%p872_p0)
}
  0x8d   : > { %741 = dma.vmem_to_hbm [thread:$0]  (%p1120_p7), %s1206_s14, 64, %s541_s27, %s506_s22  }
  0x8e   : > { %s890_s28 = sshra.s32 %s555_s25, 4  ;;  %s896_s30 = scalar_lea.hbm %s1309_s4, 2  ;;  %s891_s28 = int_to_ptr.hbm [resolvable:$true] %s890_s28 }
  0x8f   : > { %s892_s0 = scalar_lea.hbm %s891_s28, 1  ;;  %p897_p4 = scmp.lt.s32.totalorder %s891_s28, %s1309_s4 }
  0x90   : > { %p893_p1 = scmp.ne.s32.totalorder %s891_s28, %s892_s0  ;;  %p898_p5 = scmp.lt.s32.totalorder %s896_s30, %s892_s0 }
  0x92   : > { %p894_p2 = pnand %p893_p1, %p1120_p7  ;;  %p899_p6 = por %p898_p5, %p897_p4 }
  0x94   : > { %p895_p3 = pneg %p894_p2 }
  0x96   : > { %p900_p8 = pnand %p899_p6, %p895_p3 }
  0x98   : > { %903 = shalt.err (!%p900_p8)
}
  0x99   : > { %742 = dma.vmem_to_hbm [thread:$0]  (%p1120_p7), %s1218_s21, 16, %s555_s25, %s506_s22   ;;  %455 = vst [vmem:[%s1165_s18] sm:$0xf] %v454_v62 }
  0x9a   : > { %s501_s14 = scalar_lea.sflag [#allocation4], %s1153_s26  ;;  %s918_s27 = sshra.s32 %s1225_s5, 4  ;;  %s919_s27 = int_to_ptr.hbm [resolvable:$true] %s918_s27 }
  0x9b   : > { %s920_s23 = scalar_lea.hbm %s919_s27, 4  ;;  %s924_s0 = scalar_lea.hbm %s1307_s2, 8 }
  0x9c   : > { %p921_p9 = scmp.ne.s32.totalorder %s919_s27, %s920_s23  ;;  %p925_p13 = scmp.lt.s32.totalorder %s919_s27, %s1307_s2 }
  0x9d   : > { %p926_p0 = scmp.lt.s32.totalorder %s924_s0, %s920_s23 }
  0x9e   : > { %p922_p10 = pnand %p921_p9, %p1120_p7 }
  0x9f   : > { %p927_p1 = por %p926_p0, %p925_p13 }
  0xa0   : > { %p923_p11 = pneg %p922_p10 }
  0xa2   : > { %p928_p2 = pnand %p927_p1, %p923_p11 }
  0xa4   : > { %931 = shalt.err (!%p928_p2)
}
  0xa5   : > { %740 = dma.vmem_to_hbm [thread:$0]  (%p1120_p7), %s1223_s20, 64, %s1225_s5, %s501_s14  }
  0xa6 PF: > { %p756_p3 = scmp.ge.s32.totalorder %s1018_s24, 2  ;;  %s566_s26 = sand.u32 1, %s982_s15  }
  0xa7   : > { %s567_s18 = scalar_lea.sflag [#allocation4], %s566_s26 }
  0xa8   : > { %p747_p4 = pnand %p756_p3, %p1130_p12 }
  0xaa   : > { %p748_p5 = pneg %p747_p4 }
  0xac   : > { %973 = dma.done.wait (%p748_p5), %s567_s18, 64  }
  0xad   : > { %975 = vsyncadd (%p748_p5), %s567_s18, 4294967232  ;;  %s1326_s21 = sadd.s32 4294967294, %s1018_s24  }
  0xae   : > { %s576_s25 = sand.u32 1, %s1326_s21  }
  0xaf   : > { %s577_s22 = scalar_lea.sflag [#allocation6], %s576_s25 }
  0xb0   : > { %977 = dma.done.wait (%p748_p5), %s577_s22, 80  }
  0xb1   : > { %979 = vsyncadd (%p748_p5), %s577_s22, 4294967216  ;;  %s21_s24 = sadd.s32 1, %s1018_s24   ;;  %s1327_s20 = sld [smem:[#allocation10_spill]] }
  0xb2   : > { %p18_p7 = scmp.ge.s32.totalorder %s21_s24, 8   ;;  %s1328_s21 = sld [smem:[#allocation11_spill]] }
  0xb3   : > { %s1329_s22 = sld [smem:[#allocation12_spill]]  ;;  %s1331_s15 = smov %s986_s16 }
  0xb4   : > { %s1330_s23 = sld [smem:[#allocation13_spill]]  ;;  %s1332_s16 = smov %s990_s17 }
  0xb5   : > { %s1333_s17 = smov %s1135_s11  ;;  %s1334_s18 = smov %s998_s19 }
  0xb6   : > { %s1335_s19 = smov %s1138_s12  ;;  %20 = sbr.rel (!%p18_p7) target bundleno = 10 (0xa), region = 145 }
  0xbb   :  { %592 = vsyncpa [#allocation4], 1 }
  0xbc   :  { %594 = vsyncpa [#allocation4 + $0x1], 1 }
  0xbd   :  { %595 = vsyncpa [#allocation6], 1 }
  0xbe   :  { %597 = vsyncpa [#allocation6 + $0x1], 1 }

</bundles_post_ra>
